<compile_context>
chip_gen: v5e
topology: v5e:2x2
jax: 0.10.0
libtpu: 0.0.40
codegen_flags: <defaults>
</compile_context>

<pallas_src>
import jax
import jax.numpy as jnp
from jax.experimental import pallas as pl
from jax.experimental.pallas import tpu as pltpu


def sp_kernel(mask_ref, state_ref, w1t_ref, b1w2_ref, b2_ref, out_ref):
    """One grid step processes a block of `block_b` batch rows.

    mask_ref  : (BB, L, N) f32  token->sentence mapping (all_mapping), dense layout
    state_ref : (BB, L, D) f32  token hidden states (input_state), dense layout
    w1t_ref   : (D, D)  bf16    first Linear weight, pre-transposed to (in, out)
    b1w2_ref  : (2, D)  f32     row 0 = b1, row 1 = weight row of the D->1 Linear
    b2_ref    : (1,)    f32     second Linear bias, SMEM scalar
    out_ref   : (BB*N, 1) f32   sentence logits column (wrapper reshapes to (B, N, 1))
    """
    mask = mask_ref[...]        # [BB, L, N]
    state = state_ref[...]      # [BB, L, D]
    BB, L, N = mask.shape
    D = state.shape[-1]

    # Masked max-pool over tokens (broadcasts done in-kernel; inputs DMA'd dense):
    #   sp[b, n, d] = max_l ( mask[b, l, n] * state[b, l, d] )
    masked = mask[:, :, :, None] * state[:, :, None, :]   # [BB, L, N, D]
    sp = jnp.max(masked, axis=1)                           # [BB, N, D]

    # fc_sf[0]: Linear(D, D) + ReLU, all BB*N rows in one bf16 MXU pass (f32 acc).
    sp2 = sp.reshape(BB * N, D).astype(w1t_ref.dtype)      # single merge-reshape
    b1 = b1w2_ref[0:1, :]                                  # (1, D) f32
    w2 = b1w2_ref[1:2, :]                                  # (1, D) f32
    h = jnp.dot(sp2, w1t_ref[...], preferred_element_type=jnp.float32) + b1
    h = jnp.maximum(h, 0.0)                                # [BB*N, D] f32

    # fc_sf[2]: Linear(D, 1) on the VPU: scale by the weight row, lane-reduce over D.
    logits = jnp.sum(h * w2, axis=-1, keepdims=True) + b2_ref[0]   # [BB*N, 1]
    out_ref[...] = logits.astype(out_ref.dtype)


def _choose_block_b(B, L, N, D):
    """Pick the batch block size.

    Goals (per perf review):
      * >= 2 grid steps once B is large enough, so dimension_semantics=("parallel",)
        can shard across v7x's two TensorCores (no-op on a 1-step grid) and the
        input/output pipeline overlaps,
      * keep block_b a multiple of 8 whenever block_b < B (f32 sublane constraint
        on the (block_b*N, 1) output block),
      * cap the per-step VMEM footprint well under v7x's 32 MiB default scoped VMEM.
    """
    lane = 128
    # Approx f32 bytes held in VMEM per batch row at once:
    #   double-buffered DMA blocks for mask (L, pad128(N)) and state (L, pad128(D))
    #   + live intermediates: masked (L, N, D) product and a few (N, D) tiles.
    per_b = 4 * (2 * L * (max(N, lane) + max(D, lane))
                 + L * N * max(D, lane) + 4 * N * max(D, lane))
    budget = 20 * 1024 * 1024                     # headroom under v7x's 32 MiB scoped VMEM
    cap = max(8, (budget // per_b) // 8 * 8)

    if B >= 16 and B % 8 == 0:
        bb = min(cap, max(8, ((B // 2) // 8) * 8))
        while bb > 8 and B % bb:
            bb -= 8
        if B % bb == 0:
            return bb
    return B                                       # small B (demo: B=2) -> single step


def simple_prediction_layer(all_mapping, input_state, w1, b1, w2, b2):
    """Wrapper.

    all_mapping : [B, L, N]   input_state : [B, L, D]
    w1 : [D, D] (out, in)  b1 : [D]  w2 : [1, D]  b2 : [1]   (PyTorch Linear layout)
    Returns [B, N, 1] to match the PyTorch module output.
    """
    B, L, N = all_mapping.shape
    D = input_state.shape[-1]
    block_b = _choose_block_b(B, L, N, D)
    grid_b = pl.cdiv(B, block_b)

    # Free XLA-side plumbing (no compute hoisting, no padded layouts):
    w1t = w1.T.astype(jnp.bfloat16)                         # (in, out) bf16 MXU operand
    b1w2 = jnp.concatenate([b1.reshape(1, D),
                            w2.reshape(1, D)], axis=0)      # (2, D) f32, single operand
    b2s = b2.reshape(1)                                      # SMEM scalar

    out_col = pl.pallas_call(
        sp_kernel,
        out_shape=jax.ShapeDtypeStruct((B * N, 1), jnp.float32),
        grid=(grid_b,),
        in_specs=[
            pl.BlockSpec((block_b, L, N), lambda b: (b, 0, 0)),   # dense (L, N) tail
            pl.BlockSpec((block_b, L, D), lambda b: (b, 0, 0)),   # dense (L, D) tail
            pl.BlockSpec((D, D), lambda b: (0, 0)),
            pl.BlockSpec((2, D), lambda b: (0, 0)),
            pl.BlockSpec(memory_space=pltpu.MemorySpace.SMEM),
        ],
        out_specs=pl.BlockSpec((block_b * N, 1), lambda b: (b, 0)),
        compiler_params=pltpu.CompilerParams(
            dimension_semantics=("parallel",),
            vmem_limit_bytes=32 * 1024 * 1024),
    )(all_mapping, input_state, w1t, b1w2, b2s)

    return out_col.reshape(B, N, 1)


def reference(all_mapping, input_state, w1, b1, w2, b2):
    sp_state = jnp.max(
        all_mapping[:, :, :, None] * input_state[:, :, None, :], axis=1)
    h = jnp.maximum(sp_state @ w1.T + b1, 0.0)
    return h @ w2.T + b2


if __name__ == "__main__":
    # config.input_dim = 8  ->  self.input_dim = 32
    B, L, N, D = 2, 16, 8, 32

    key = jax.random.PRNGKey(0)
    k_map, k_state, k_w1, k_b1, k_w2, k_b2 = jax.random.split(key, 6)

    # all_mapping: 0/1 token->sentence map; input_state: token hidden states.
    all_mapping = (jax.random.uniform(k_map, (B, L, N)) > 0.5).astype(jnp.float32)
    input_state = jax.random.normal(k_state, (B, L, D), dtype=jnp.float32)

    # fc_sf parameters (PyTorch Linear layout: weight [out, in], bias [out]).
    w1 = jax.random.normal(k_w1, (D, D), dtype=jnp.float32) * 0.05
    b1 = jax.random.normal(k_b1, (D,), dtype=jnp.float32) * 0.05
    w2 = jax.random.normal(k_w2, (1, D), dtype=jnp.float32) * 0.05
    b2 = jax.random.normal(k_b2, (1,), dtype=jnp.float32) * 0.05

    # NOTE: batch['pooled'], 'query_mapping', 'context_mask', 'query_length',
    # 'start_position', 'end_position' are read but unused in the PyTorch forward,
    # so they are omitted here.

    out = simple_prediction_layer(all_mapping, input_state, w1, b1, w2, b2)
    out = jax.block_until_ready(out)

    ref = reference(all_mapping, input_state, w1, b1, w2, b2)
    assert out.shape == (B, N, 1), out.shape
    # bf16 MXU operands (per perf review) -> bf16-appropriate tolerance.
    assert jnp.allclose(out, ref, atol=3e-2, rtol=3e-2), \
        float(jnp.max(jnp.abs(out - ref)))

    print("KERNEL_OK")
</pallas_src>

<mosaic_0001>
module attributes {stable_mosaic.version = 11 : i64} {
  func.func @sp_kernel(%arg0: i32, %arg1: memref<2x16x8xf32, #tpu.memory_space<vmem>>, %arg2: memref<2x16x32xf32, #tpu.memory_space<vmem>>, %arg3: memref<32x32xbf16, #tpu.memory_space<vmem>>, %arg4: memref<2x32xf32, #tpu.memory_space<vmem>>, %arg5: memref<1xf32, #tpu.memory_space<smem>>, %arg6: memref<16x1xf32, #tpu.memory_space<vmem>>) attributes {dimension_semantics = [#tpu.dimension_semantics<parallel>], iteration_bounds = array<i64: 1>, scalar_prefetch = 0 : i64, scratch_operands = 0 : i64, tpu.core_type = #tpu.core_type<tc>, window_params = [{transform_indices = @transform_0, window_bounds = array<i64: 2, 16, 8>}, {transform_indices = @transform_1, window_bounds = array<i64: 2, 16, 32>}, {pipeline_mode = #tpu.pipeline_mode<synchronous>, transform_indices = @transform_2, window_bounds = array<i64: 32, 32>}, {pipeline_mode = #tpu.pipeline_mode<synchronous>, transform_indices = @transform_3, window_bounds = array<i64: 2, 32>}, {transform_indices = @transform_4, window_bounds = array<i64: 1>}, {transform_indices = @transform_5, window_bounds = array<i64: 16, 1>}]} {
    %c0 = arith.constant 0 : index
    %c0_0 = arith.constant 0 : index
    %c0_1 = arith.constant 0 : index
    %0 = vector.load %arg1[%c0, %c0_0, %c0_1] : memref<2x16x8xf32, #tpu.memory_space<vmem>>, vector<2x16x8xf32>
    %c0_2 = arith.constant 0 : index
    %c0_3 = arith.constant 0 : index
    %c0_4 = arith.constant 0 : index
    %1 = vector.load %arg2[%c0_2, %c0_3, %c0_4] : memref<2x16x32xf32, #tpu.memory_space<vmem>>, vector<2x16x32xf32>
    %2 = vector.shape_cast %0 : vector<2x16x8xf32> to vector<2x16x8x1xf32>
    %3 = vector.shape_cast %1 : vector<2x16x32xf32> to vector<2x16x1x32xf32>
    %4 = vector.broadcast %2 : vector<2x16x8x1xf32> to vector<2x16x8x32xf32>
    %5 = vector.broadcast %3 : vector<2x16x1x32xf32> to vector<2x16x8x32xf32>
    %6 = arith.mulf %4, %5 : vector<2x16x8x32xf32>
    %cst = arith.constant dense<0xFF800000> : vector<2x8x32xf32>
    %7 = vector.multi_reduction <maximumf>, %6, %cst [1] : vector<2x16x8x32xf32> to vector<2x8x32xf32>
    %8 = vector.shape_cast %7 : vector<2x8x32xf32> to vector<16x32xf32>
    %9 = arith.truncf %8 : vector<16x32xf32> to vector<16x32xbf16>
    %c0_5 = arith.constant 0 : index
    %c0_6 = arith.constant 0 : index
    %10 = vector.load %arg4[%c0_5, %c0_6] : memref<2x32xf32, #tpu.memory_space<vmem>>, vector<1x32xf32>
    %c1 = arith.constant 1 : index
    %c0_7 = arith.constant 0 : index
    %11 = vector.load %arg4[%c1, %c0_7] : memref<2x32xf32, #tpu.memory_space<vmem>>, vector<1x32xf32>
    %c0_8 = arith.constant 0 : index
    %c0_9 = arith.constant 0 : index
    %12 = vector.load %arg3[%c0_8, %c0_9] : memref<32x32xbf16, #tpu.memory_space<vmem>>, vector<32x32xbf16>
    %cst_10 = arith.constant dense<0.000000e+00> : vector<16x32xf32>
    %13 = tpu.matmul %9, %12, %cst_10 {dimension_numbers = #tpu.dot_dimension_numbers<[1], [0], [0], [1], [0, 0, 1, 1], [], []>} : vector<16x32xbf16>, vector<32x32xbf16>, vector<16x32xf32> -> vector<16x32xf32>
    %14 = vector.broadcast %10 : vector<1x32xf32> to vector<16x32xf32>
    %15 = arith.addf %13, %14 : vector<16x32xf32>
    %cst_11 = arith.constant 0.000000e+00 : f32
    %16 = vector.broadcast %cst_11 : f32 to vector<16x32xf32>
    %17 = arith.maximumf %15, %16 : vector<16x32xf32>
    %18 = vector.broadcast %11 : vector<1x32xf32> to vector<16x32xf32>
    %19 = arith.mulf %17, %18 : vector<16x32xf32>
    %cst_12 = arith.constant dense<0.000000e+00> : vector<16xf32>
    %20 = vector.multi_reduction <add>, %19, %cst_12 [1] : vector<16x32xf32> to vector<16xf32>
    %21 = vector.shape_cast %20 : vector<16xf32> to vector<16x1xf32>
    %c0_13 = arith.constant 0 : index
    %22 = memref.load %arg5[%c0_13] : memref<1xf32, #tpu.memory_space<smem>>
    %23 = vector.broadcast %22 : f32 to vector<16x1xf32>
    %24 = arith.addf %21, %23 : vector<16x1xf32>
    %c0_14 = arith.constant 0 : index
    %c0_15 = arith.constant 0 : index
    %25 = vector.load %arg6[%c0_14, %c0_15] : memref<16x1xf32, #tpu.memory_space<vmem>>, vector<16x1xf32>
    tpu.vector_store %arg6[%c0_14, %c0_15], %24 {strides = array<i32>} : memref<16x1xf32, #tpu.memory_space<vmem>>, vector<16x1xf32>,
    return
  }
  func.func @transform_0(%arg0: i32) -> (i32, i32, i32) {
    %c0_i32 = arith.constant 0 : i32
    %c0_i32_0 = arith.constant 0 : i32
    %c0_i32_1 = arith.constant 0 : i32
    return %arg0, %c0_i32, %c0_i32_0 : i32, i32, i32
  }
  func.func @transform_1(%arg0: i32) -> (i32, i32, i32) {
    %c0_i32 = arith.constant 0 : i32
    %c0_i32_0 = arith.constant 0 : i32
    %c0_i32_1 = arith.constant 0 : i32
    return %arg0, %c0_i32, %c0_i32_0 : i32, i32, i32
  }
  func.func @transform_2(%arg0: i32) -> (i32, i32) {
    %c0_i32 = arith.constant 0 : i32
    %c0_i32_0 = arith.constant 0 : i32
    %c0_i32_1 = arith.constant 0 : i32
    return %c0_i32, %c0_i32_0 : i32, i32
  }
  func.func @transform_3(%arg0: i32) -> (i32, i32) {
    %c0_i32 = arith.constant 0 : i32
    %c0_i32_0 = arith.constant 0 : i32
    %c0_i32_1 = arith.constant 0 : i32
    return %c0_i32, %c0_i32_0 : i32, i32
  }
  func.func @transform_4(%arg0: i32) -> i32 {
    %c0_i32 = arith.constant 0 : i32
    %c0_i32_0 = arith.constant 0 : i32
    return %c0_i32 : i32
  }
  func.func @transform_5(%arg0: i32) -> (i32, i32) {
    %c0_i32 = arith.constant 0 : i32
    %c0_i32_0 = arith.constant 0 : i32
    return %arg0, %c0_i32 : i32, i32
  }
}

</mosaic_0001>

<bundles_post_ra>
// kernel: tpu_custom_call.1
= control target key start
LH: loop header
LB: loop body
LE: loop exit
PB: predicated region body
PF: predicated region fallthrough
CT: control target
= control target key end

     0   :  { %v31_v0 = vlaneseq  ;;  %vm382_vm0 = vcmask 261120   ;;  %vm497_vm1 = vcmask 7168   ;;  %s727_s0 = inlined_call_operand.vmem [shape: f32[2,16,8], index: 0, kind: input, shape index: {}]   ;;  %s728_s3 = inlined_call_operand.vmem [shape: f32[2,32], index: 3, kind: input, shape index: {}]   ;;  %s729_s1 = inlined_call_operand.vmem [shape: f32[2,16,32], index: 1, kind: input, shape index: {}]   ;;  %s730_s2 = inlined_call_operand.vmem [shape: bf16[32,32], index: 2, kind: input, shape index: {}]   ;;  %s731_s4 = inlined_call_operand.<no memory space> [shape: f32[1], index: 4, kind: input, shape index: {}]   ;;  %s732_s5 = inlined_call_operand.vmem [shape: f32[16,1], index: 5, kind: output, shape index: {}]  }
   0x1   :  { %v24_v2 = vld [vmem:[%s727_s0 + $0x10] sm:$0xff]  ;;  %v22_v3 = vld [vmem:[%s727_s0] sm:$0xff]  ;;  %v23_v19 = vld [vmem:[%s727_s0 + $0x8] sm:$0xff] }
   0x2   :  { %v32_v1 = vshrl.u32 %v31_v0, 7  ;;  %v142_v4 = vperm.slane %v24_v2, 0  ;;  %v44_v5 = vperm.slane %v22_v3, 2  ;;  %v30_v6 = vperm.slane %v22_v3, 0  ;;  %v25_v23 = vld [vmem:[%s727_s0 + $0x18] sm:$0xff]  ;;  %v565_v39 = vld [vmem:[%s729_s1] sm:$0xff] }
   0x3   :  { %v149_v7 = vperm.slane %v24_v2, 1  ;;  %v51_v8 = vperm.slane %v22_v3, 3  ;;  %v37_v9 = vperm.slane %v22_v3, 1  ;;  %v58_v10 = vperm.slane %v22_v3, 4  ;;  %v594_v0 = vld [vmem:[%s729_s1 + $0x10] sm:$0xff] }
   0x4   :  { %517 = vset.pattern.permute.xlu2 %v32_v1  ;;  %516 = vset.pattern.permute.xlu1 %v32_v1  ;;  %v163_v11 = vperm.slane %v24_v2, 3  ;;  %v156_v12 = vperm.slane %v24_v2, 2  ;;  %v177_v13 = vperm.slane %v24_v2, 5  ;;  %v170_v14 = vperm.slane %v24_v2, 4 }
   0x5   :  { %515 = vset.pattern.permute.xlu0 %v32_v1  ;;  %v65_v15 = vperm.slane %v22_v3, 5  ;;  %v184_v16 = vperm.slane %v24_v2, 6  ;;  %v79_v17 = vperm.slane %v22_v3, 7  ;;  %v72_v18 = vperm.slane %v22_v3, 6 }
   0x6   :  { %v93_v20 = vperm.slane %v23_v19, 1  ;;  %v86_v21 = vperm.slane %v23_v19, 0  ;;  %v191_v22 = vperm.slane %v24_v2, 7  ;;  %v100_v24 = vperm.slane %v23_v19, 2 }
   0x7   :  { %v205_v25 = vperm.slane %v25_v23, 1  ;;  %v198_v26 = vperm.slane %v25_v23, 0  ;;  %v219_v27 = vperm.slane %v25_v23, 3  ;;  %v212_v28 = vperm.slane %v25_v23, 2 }
   0x8   :  { %v107_v29 = vperm.slane %v23_v19, 3  ;;  %v226_v30 = vperm.slane %v25_v23, 4  ;;  %v121_v31 = vperm.slane %v23_v19, 5  ;;  %v114_v32 = vperm.slane %v23_v19, 4 }
   0x9   :  { %v135_v33 = vperm.slane %v23_v19, 7  ;;  %v128_v34 = vperm.slane %v23_v19, 6  ;;  %v233_v35 = vperm.slane %v25_v23, 5  ;;  %v247_v36 = vperm.slane %v25_v23, 7  ;;  %v514_v19 = vld [vmem:[%s730_s2 + $0x8] sm:$0xff] }
   0xa   :  { %v240_v37 = vperm.slane %v25_v23, 6  ;;  %v259_v40 = vrot.slane %v565_v39, 2  ;;  %v286_v43 = vperm.slane %v565_v39, 0  ;;  %v272_v2 = vrot.slane %v594_v0, 1  ;;  %474 = vmatpush.bf16.msra.mxu0 %v514_v19 }
   0xb   :  { %v261_v3 = vrot.slane %v565_v39, 4 }
   0xc   :  { %147 = vperm.xlu2 %517, %v142_v4   ;;  %49 = vperm.xlu1 %516, %v44_v5   ;;  %v288_v42 = vperm.slane %v259_v40, 0  ;;  %v302_v4 = vperm.slane %v594_v0, 0  ;;  %v276_v5 = vrot.slane %v594_v0, 5  ;;  %v263_v40 = vrot.slane %v565_v39, 6 }
   0xd   :  { %35 = vperm.xlu0 %515, %v30_v6   ;;  %v260_v6 = vrot.slane %v565_v39, 3 }
  0x14   :  { %154 = vperm.xlu2 %517, %v149_v7   ;;  %56 = vperm.xlu1 %516, %v51_v8   ;;  %v606_v7 = vld [vmem:[%s729_s1 + $0x8] sm:$0xff] }
  0x15   :  { %42 = vperm.xlu0 %515, %v37_v9   ;;  %v303_v9 = vperm.slane %v272_v2, 0 }
  0x1c   :  { %63 = vperm.xlu2 %517, %v58_v10   ;;  %168 = vperm.xlu1 %516, %v163_v11   ;;  %v258_v10 = vrot.slane %v565_v39, 1  ;;  %v274_v11 = vrot.slane %v594_v0, 3 }
  0x1d   :  { %161 = vperm.xlu0 %515, %v156_v12  }
  0x24   :  { %182 = vperm.xlu2 %517, %v177_v13   ;;  %175 = vperm.xlu1 %516, %v170_v14   ;;  %v290_v13 = vperm.slane %v261_v3, 0  ;;  %v277_v14 = vrot.slane %v594_v0, 6 }
  0x25   :  { %70 = vperm.xlu0 %515, %v65_v15  }
  0x2c   :  { %189 = vperm.xlu2 %517, %v184_v16   ;;  %84 = vperm.xlu1 %516, %v79_v17   ;;  %v265_v17 = vrot.slane %v606_v7, 1 }
  0x2d   :  { %77 = vperm.xlu0 %515, %v72_v18   ;;  %v273_v18 = vrot.slane %v594_v0, 2 }
  0x34   :  { %98 = vperm.xlu2 %517, %v93_v20   ;;  %91 = vperm.xlu1 %516, %v86_v21   ;;  %v307_v20 = vperm.slane %v276_v5, 0  ;;  %v289_v21 = vperm.slane %v260_v6, 0  ;;  %v278_v5 = vrot.slane %v594_v0, 7 }
  0x35   :  { %196 = vperm.xlu0 %515, %v191_v22   ;;  %v625_v22 = vld [vmem:[%s729_s1 + $0x18] sm:$0xff] }
  0x3c   :  { %105 = vperm.xlu2 %517, %v100_v24   ;;  %210 = vperm.xlu1 %516, %v205_v25   ;;  %v287_v24 = vperm.slane %v258_v10, 0  ;;  %v305_v25 = vperm.slane %v274_v11, 0 }
  0x3d   :  { %203 = vperm.xlu0 %515, %v198_v26   ;;  %v266_v26 = vrot.slane %v606_v7, 2 }
  0x44   :  { %224 = vperm.xlu2 %517, %v219_v27   ;;  %217 = vperm.xlu1 %516, %v212_v28   ;;  %v308_v28 = vperm.slane %v277_v14, 0  ;;  %v279_v14 = vrot.slane %v625_v22, 1 }
  0x45   :  { %112 = vperm.xlu0 %515, %v107_v29   ;;  %v275_v29 = vrot.slane %v594_v0, 4 }
  0x4c   :  { %231 = vperm.xlu2 %517, %v226_v30   ;;  %126 = vperm.xlu1 %516, %v121_v31   ;;  %v262_v30 = vrot.slane %v565_v39, 5 }
  0x4d   :  { %119 = vperm.xlu0 %515, %v114_v32   ;;  %v295_v32 = vperm.slane %v265_v17, 0 }
  0x54   :  { %140 = vperm.xlu2 %517, %v135_v33   ;;  %133 = vperm.xlu1 %516, %v128_v34   ;;  %v304_v33 = vperm.slane %v273_v18, 0  ;;  %v281_v34 = vrot.slane %v625_v22, 3 }
  0x55   :  { %238 = vperm.xlu0 %515, %v233_v35   ;;  %v513_v35 = vld [vmem:[%s730_s2] sm:$0xff] }
  0x56   :  { %475 = vmatpush.bf16.msra.mxu0 %v513_v35 }
  0x5c   :  { %252 = vperm.xlu1 %516, %v247_v36  }
  0x5d   :  { %245 = vperm.xlu0 %515, %v240_v37  }
  0x66   :  { %v148_v38 = vpop.permute.xlu2 %147 }
  0x67   :  { %v366_v16 = vmul.f32 %v302_v4, %v148_v38  ;;  %v264_v38 = vrot.slane %v565_v39, 7  ;;  %v313_v39 = vperm.slane %v281_v34, 0 }
  0x69   :  { %v631_v31 = vsel %vm382_vm0, %v366_v16, -inf  ;;  %v293_v6 = vperm.slane %v264_v38, 0  ;;  %v294_v16 = vperm.slane %v606_v7, 0  ;;  %v283_v38 = vrot.slane %v625_v22, 5 }
  0x6e   :  { %v155_v41 = vpop.permute.xlu2 %154 }
  0x6f   :  { %v367_v23 = vmul.f32 %v303_v9, %v155_v41  ;;  %v292_v9 = vperm.slane %v263_v40, 0 }
  0x71   :  { %v415_v41 = vsel %vm382_vm0, %v367_v23, -inf }
  0x76   :  { %v64_v51 = vpop.permute.xlu2 %63 }
  0x77   :  { %v354_v27 = vmul.f32 %v290_v13, %v64_v51  ;;  %v291_v51 = vperm.slane %v262_v30, 0  ;;  %v271_v13 = vrot.slane %v606_v7, 7 }
  0x7e   :  { %v50_v44 = vpop.permute.xlu1 %49  ;;  %v183_v55 = vpop.permute.xlu2 %182 }
  0x7f   :  { %v352_v45 = vmul.f32 %v288_v42, %v50_v44  ;;  %v36_v46 = vpop.permute.xlu0 %35  ;;  %v371_v36 = vmul.f32 %v307_v20, %v183_v55  ;;  %v296_v44 = vperm.slane %v266_v26, 0  ;;  %v282_v55 = vrot.slane %v625_v22, 4 }
  0x80   :  { %v350_v47 = vmul.f32 %v286_v43, %v36_v46  ;;  %v389_v46 = vsel %vm382_vm0, %v354_v27, -inf  ;;  %v309_v20 = vperm.slane %v278_v5, 0 }
  0x81   :  { %v570_v48 = vsel %vm382_vm0, %v352_v45, -inf  ;;  %v656_v0 = vperm.slane %v282_v55, 0 }
  0x82   :  { %v573_v49 = vsel %vm382_vm0, %v350_v47, -inf  ;;  %v306_v47 = vperm.slane %v275_v29, 0  ;;  %v269_v29 = vrot.slane %v606_v7, 5 }
  0x83   :  { %v386_v50 = vmax.f32 %v573_v49, %v570_v48 }
  0x86   :  { %v57_v52 = vpop.permute.xlu1 %56  ;;  %v190_v59 = vpop.permute.xlu2 %189 }
  0x87   :  { %v43_v53 = vpop.permute.xlu0 %42  ;;  %v353_v37 = vmul.f32 %v289_v21, %v57_v52  ;;  %v372_v3 = vmul.f32 %v308_v28, %v190_v59 }
  0x88   :  { %v351_v42 = vmul.f32 %v287_v24, %v43_v53  ;;  %v422_v53 = vsel %vm382_vm0, %v371_v36, -inf  ;;  %v267_v24 = vrot.slane %v606_v7, 3 }
  0x89   :  { %v660_v17 = vsel %vm382_vm0, %v372_v3, -inf }
  0x8a   :  { %v384_v10 = vsel %vm382_vm0, %v351_v42, -inf  ;;  %v270_v42 = vrot.slane %v606_v7, 6 }
  0x8e   :  { %v169_v54 = vpop.permute.xlu1 %168  ;;  %v587_v62 = vpop.permute.xlu2 %98 }
  0x8f   :  { %v577_v56 = vpop.permute.xlu0 %161  ;;  %v369_v43 = vmul.f32 %v305_v25, %v169_v54  ;;  %v387_v54 = vsel %vm382_vm0, %v353_v37, -inf  ;;  %v359_v59 = vmul.f32 %v295_v32, %v587_v62  ;;  %v280_v62 = vrot.slane %v625_v22, 2 }
  0x90   :  { %v368_v4 = vmul.f32 %v304_v33, %v577_v56  ;;  %v390_v56 = vmax.f32 %v386_v50, %v389_v46  ;;  %v388_v21 = vmax.f32 %v384_v10, %v387_v54  ;;  %v668_v50 = vperm.slane %v271_v13, 0 }
  0x91   :  { %v418_v11 = vsel %vm382_vm0, %v369_v43, -inf  ;;  %v311_v25 = vperm.slane %v279_v14, 0  ;;  %v399_v27 = vsel %vm382_vm0, %v359_v59, -inf  ;;  %v312_v36 = vperm.slane %v280_v62, 0 }
  0x92   :  { %v416_v18 = vsel %vm382_vm0, %v368_v4, -inf  ;;  %v419_v23 = vmax.f32 %v415_v41, %v418_v11  ;;  %v297_v37 = vperm.slane %v267_v24, 0  ;;  %v299_v46 = vperm.slane %v269_v29, 0 }
  0x93   :  { %v417_v28 = vmax.f32 %v631_v31, %v416_v18  ;;  %v315_v54 = vperm.slane %v283_v38, 0  ;;  %v285_v13 = vrot.slane %v625_v22, 7 }
  0x94   :  { %v423_v35 = vmax.f32 %v419_v23, %v422_v53 }
  0x96   :  { %v579_v57 = vpop.permute.xlu1 %175  ;;  %v608_v8 = vpop.permute.xlu2 %105 }
  0x97   :  { %v581_v58 = vpop.permute.xlu0 %70  ;;  %v370_v48 = vmul.f32 %v306_v47, %v579_v57 }
  0x98   :  { %v355_v19 = vmul.f32 %v291_v51, %v581_v58  ;;  %v310_v58 = vperm.slane %v625_v22, 0 }
  0x99   :  { %v420_v31 = vsel %vm382_vm0, %v370_v48, -inf  ;;  %v317_v48 = vperm.slane %v285_v13, 0 }
  0x9a   :  { %v391_v32 = vsel %vm382_vm0, %v355_v19, -inf  ;;  %v421_v4 = vmax.f32 %v417_v28, %v420_v31 }
  0x9b   :  { %v392_v43 = vmax.f32 %v388_v21, %v391_v32 }
  0x9e   :  { %v583_v60 = vpop.permute.xlu1 %84  ;;  %v225_v2 = vpop.permute.xlu2 %224 }
  0x9f   :  { %v585_v61 = vpop.permute.xlu0 %77  ;;  %v357_v49 = vmul.f32 %v293_v6, %v583_v60  ;;  %v268_v60 = vrot.slane %v606_v7, 4  ;;  %v377_v5 = vmul.f32 %v313_v39, %v225_v2  ;;  %v284_v39 = vrot.slane %v625_v22, 6 }
  0xa0   :  { %v356_v33 = vmul.f32 %v292_v9, %v585_v61  ;;  %v360_v61 = vmul.f32 %v296_v44, %v608_v8  ;;  %v300_v44 = vperm.slane %v270_v42, 0 }
  0xa1   :  { %v395_v40 = vsel %vm382_vm0, %v357_v49, -inf  ;;  %v298_v3 = vperm.slane %v268_v60, 0  ;;  %v434_v21 = vsel %vm382_vm0, %v377_v5, -inf }
  0xa2   :  { %v393_v47 = vsel %vm382_vm0, %v356_v33, -inf  ;;  %v396_v53 = vmax.f32 %v392_v43, %v395_v40  ;;  %v401_v59 = vsel %vm382_vm0, %v360_v61, -inf }
  0xa4   :  { %v400_v24 = vmax.f32 %v396_v53, %v399_v27 }
  0xa6   :  { %v589_v63 = vpop.permute.xlu1 %91  ;;  %v232_v34 = vpop.permute.xlu2 %231 }
  0xa7   :  { %v596_v1 = vpop.permute.xlu0 %196  ;;  %v358_v41 = vmul.f32 %v294_v16, %v589_v63  ;;  %v378_v22 = vmul.f32 %v656_v0, %v232_v34 }
  0xa8   :  { %v373_v57 = vmul.f32 %v309_v20, %v596_v1 }
  0xa9   :  { %v397_v63 = vsel %vm382_vm0, %v358_v41, -inf  ;;  %v436_v34 = vsel %vm382_vm0, %v378_v22, -inf }
  0xaa   :  { %v426_v51 = vsel %vm382_vm0, %v373_v57, -inf }
  0xab   :  { %v427_v9 = vmax.f32 %v423_v35, %v426_v51  ;;  %v518_v51 = vld [vmem:[%s728_s3] ss:$0 sm:$0xff] }
  0xae   :  { %v612_v12 = vpop.permute.xlu1 %210  ;;  %v141_v23 = vpop.permute.xlu2 %140 }
  0xaf   :  { %v615_v15 = vpop.permute.xlu0 %203  ;;  %v375_v1 = vmul.f32 %v311_v25, %v612_v12  ;;  %v394_v12 = vmax.f32 %v390_v56, %v393_v47 }
  0xb0   :  { %v374_v55 = vmul.f32 %v310_v58, %v615_v15 }
  0xb1   :  { %v430_v10 = vsel %vm382_vm0, %v375_v1, -inf  ;;  %v398_v16 = vmax.f32 %v394_v12, %v397_v63  ;;  %v494_v12 = vstv %s731_s4 }
  0xb2   :  { %v428_v15 = vsel %vm382_vm0, %v374_v55, -inf  ;;  %v431_v18 = vmax.f32 %v427_v9, %v430_v10 }
  0xb3   :  { %v402_v58 = vmax.f32 %v398_v16, %v401_v59 }
  0xb4   :  { %v435_v33 = vmax.f32 %v431_v18, %v434_v21 }
  0xb6   :  { %v640_v45 = vpop.permute.xlu1 %217 }
  0xb7   :  { %v113_v52 = vpop.permute.xlu0 %112  ;;  %v376_v7 = vmul.f32 %v312_v36, %v640_v45  ;;  %v425_v45 = vmax.f32 %v421_v4, %v660_v17  ;;  %v316_v17 = vperm.slane %v284_v39, 0  ;;  %v519_v4 = vld [vmem:[%s728_s3 + $0x1] ss:$0 sm:$0xff] }
  0xb8   :  { %v361_v8 = vmul.f32 %v297_v37, %v113_v52 }
  0xb9   :  { %v432_v56 = vsel %vm382_vm0, %v376_v7, -inf  ;;  %v429_v62 = vmax.f32 %v425_v45, %v428_v15 }
  0xba   :  { %v403_v19 = vsel %vm382_vm0, %v361_v8, -inf }
  0xbb   :  { %v404_v28 = vmax.f32 %v400_v24, %v403_v19 }
  0xbe   :  { %v127_v26 = vpop.permute.xlu1 %126 }
  0xbf   :  { %v120_v30 = vpop.permute.xlu0 %119  ;;  %v363_v14 = vmul.f32 %v299_v46, %v127_v26  ;;  %v433_v26 = vmax.f32 %v429_v62, %v432_v56 }
  0xc0   :  { %v362_v2 = vmul.f32 %v298_v3, %v120_v30  ;;  %v365_v30 = vmul.f32 %v668_v50, %v141_v23 }
  0xc1   :  { %v407_v49 = vsel %vm382_vm0, %v363_v14, -inf  ;;  %v437_v40 = vmax.f32 %v433_v26, %v436_v34 }
  0xc2   :  { %v405_v25 = vsel %vm382_vm0, %v362_v2, -inf  ;;  %v408_v27 = vmax.f32 %v404_v28, %v407_v49  ;;  %v411_v41 = vsel %vm382_vm0, %v365_v30, -inf }
  0xc3   :  { %v406_v60 = vmax.f32 %v402_v58, %v405_v25 }
  0xc4   :  { %v412_v61 = vmax.f32 %v408_v27, %v411_v41 }
  0xc6   :  { %v134_v6 = vpop.permute.xlu1 %133 }
  0xc7   :  { %v239_v11 = vpop.permute.xlu0 %238  ;;  %v364_v20 = vmul.f32 %v300_v44, %v134_v6 }
  0xc8   :  { %v379_v52 = vmul.f32 %v315_v54, %v239_v11 }
  0xc9   :  { %v409_v32 = vsel %vm382_vm0, %v364_v20, -inf }
  0xca   :  { %v438_v29 = vsel %vm382_vm0, %v379_v52, -inf  ;;  %v410_v38 = vmax.f32 %v406_v60, %v409_v32 }
  0xcb   :  { %v439_v36 = vmax.f32 %v435_v33, %v438_v29 }
  0xcc   :  { %v413_v1 = vmax.f32 %v410_v38, %v412_v61 }
  0xce   :  { %v253_v57 = vpop.permute.xlu1 %252 }
  0xcf   :  { %v381_v35 = vmul.f32 %v317_v48, %v253_v57  ;;  %v246_v0 = vpop.permute.xlu0 %245 }
  0xd0   :  { %v380_v37 = vmul.f32 %v316_v17, %v246_v0 }
  0xd1   :  { %v442_v31 = vsel %vm382_vm0, %v381_v35, -inf }
  0xd2   :  { %v443_v42 = vmax.f32 %v439_v36, %v442_v31  ;;  %v440_v50 = vsel %vm382_vm0, %v380_v37, -inf }
  0xd3   :  { %v441_v43 = vmax.f32 %v437_v40, %v440_v50 }
  0xd5   :  { %v444_v46 = vmax.f32 %v441_v43, %v443_v42 }
  0xd7   :  { %v445_v47 = vpack.c.bf16 %v444_v46, %v413_v1 }
  0xd9   :  { %512 = vmatmul.msk.bf16.vlgmr.msra.gmra.mxu0 %vm382_vm0, %v445_v47 }
 0x156   :  { %v477_v55 = vpop.f32.mrf.mxu0 }
 0x157   :  { %v478_v3 = vadd.f32 %v518_v51, %v477_v55 }
 0x159   :  { %v482_v5 = vmax.f32 %v478_v3, 0.0 }
 0x15b   :  { %v485_v53 = vmul.f32 %v519_v4, %v482_v5 }
 0x15d   :  { %v487_v54 = vsel %vm382_vm0, %v485_v53, 0.0 }
 0x15e   :  { %v479_v63 = vpop.f32.mrf.mxu0  ;;  %488 = vadd.xlane.f32.xlu2 %v487_v54 }
 0x15f   :  { %v480_v7 = vadd.f32 %v518_v51, %v479_v63 }
 0x161   :  { %v483_v8 = vmax.f32 %v480_v7, 0.0 }
 0x163   :  { %v486_v44 = vmul.f32 %v519_v4, %v483_v8 }
 0x165   :  { %v490_v6 = vsel %vm382_vm0, %v486_v44, 0.0 }
 0x166   :  { %491 = vadd.xlane.f32.xlu0 %v490_v6 }
 0x1d1   :  { %v489_v9 = vpop.xlane.xlu2 %488 }
 0x1d2   :  { %v495_v10 = vadd.f32 %v494_v12, %v489_v9 }
 0x1d4   :  { %498 = vst.msk [vmem:[%s732_s5] sm:$0xff] %vm497_vm1, %v495_v10 }
 0x1d9   :  { %v492_v11 = vpop.xlane.xlu0 %491 }
 0x1da   :  { %v496_v13 = vadd.f32 %v494_v12, %v492_v11 }
 0x1dc   :  { %499 = vst.msk [vmem:[%s732_s5 + $0x8] sm:$0xff] %vm497_vm1, %v496_v13 }

</bundles_post_ra>
